<compile_context>
chip_gen: v7x
topology: tpu7x:2x2x1
jax: 0.10.0
libtpu: 0.0.40
codegen_flags: <defaults>
</compile_context>

<pallas_src>
import functools

import jax
import jax.numpy as jnp
from jax.experimental import pallas as pl
from jax.experimental.pallas import tpu as pltpu


_LANES = 128
_EPS = 1e-5
# Sub-pixel tap table for ConvTranspose2d(kernel=4, stride=2, padding=1):
#   output phase p in {0,1}; window index d in {0,1}  ->  kernel tap index.
_TAPS = ((3, 1), (2, 0))


def _round_up(x, m=_LANES):
    return ((x + m - 1) // m) * m


def _pick_tile(r, cap, align=8):
    """Largest tile <= cap that divides r and is `align`-aligned, else r itself."""
    if r <= cap:
        return r
    for t in range(cap, align - 1, -1):
        if r % t == 0 and t % align == 0:
            return t
    return r


# ----------------------------------------------------------------------------
# Pallas kernels
# ----------------------------------------------------------------------------
def mm_stats_kernel(a_ref, b_ref, y_ref, s_ref):
    """One row tile of Y = A @ B plus per-column sum / sum-of-squares (BN stats)."""
    y = jnp.dot(a_ref[...], b_ref[...], preferred_element_type=jnp.float32)
    y_ref[...] = y
    s_ref[...] = jnp.concatenate(
        [jnp.sum(y, axis=0, keepdims=True),
         jnp.sum(y * y, axis=0, keepdims=True)], axis=0)


def mm_bias_tanh_kernel(a_ref, b_ref, bias_ref, o_ref):
    """Final layer: tanh(A @ B + bias), fused in the matmul epilogue."""
    y = jnp.dot(a_ref[...], b_ref[...], preferred_element_type=jnp.float32)
    o_ref[...] = jnp.tanh(y + bias_ref[...])


def bn_relu_kernel(y_ref, scale_ref, shift_ref, o_ref):
    """Fused per-channel affine (BN normalize) + ReLU."""
    o_ref[...] = jnp.maximum(y_ref[...] * scale_ref[...] + shift_ref[...], 0.0)


# ----------------------------------------------------------------------------
# Pallas wrappers
# ----------------------------------------------------------------------------
def mm_stats(a, b, tm_cap=512):
    """Batched (over phases) matmul with per-row-tile BN partial sums.

    a: (P, R, K) f32, b: (P, K, C) f32 with C a multiple of 128.
    Returns y (P, R, C) and partial stats (P, n_tiles, 2, C).
    """
    p, r, k = a.shape
    c = b.shape[2]
    tm = _pick_tile(r, tm_cap)
    nt = r // tm
    cost = pl.CostEstimate(flops=2 * p * r * k * c, transcendentals=0,
                           bytes_accessed=4 * (p * r * k + p * k * c + p * r * c))
    return pl.pallas_call(
        mm_stats_kernel,
        out_shape=(jax.ShapeDtypeStruct((p, r, c), jnp.float32),
                   jax.ShapeDtypeStruct((p, nt, 2, c), jnp.float32)),
        grid=(p, nt),
        in_specs=[pl.BlockSpec((None, tm, k), lambda pi, i: (pi, i, 0)),
                  pl.BlockSpec((None, k, c), lambda pi, i: (pi, 0, 0))],
        out_specs=(pl.BlockSpec((None, tm, c), lambda pi, i: (pi, i, 0)),
                   pl.BlockSpec((None, None, 2, c), lambda pi, i: (pi, i, 0, 0))),
        compiler_params=pltpu.CompilerParams(
            dimension_semantics=("parallel", "parallel")),
        cost_estimate=cost,
    )(a, b)


def mm_bias_tanh(a, b, bias, tm_cap=512):
    """Batched matmul with fused bias + tanh epilogue (final layer)."""
    p, r, k = a.shape
    c = b.shape[2]
    tm = _pick_tile(r, tm_cap)
    cost = pl.CostEstimate(flops=2 * p * r * k * c, transcendentals=p * r * c,
                           bytes_accessed=4 * (p * r * k + p * k * c + p * r * c))
    return pl.pallas_call(
        mm_bias_tanh_kernel,
        out_shape=jax.ShapeDtypeStruct((p, r, c), jnp.float32),
        grid=(p, r // tm),
        in_specs=[pl.BlockSpec((None, tm, k), lambda pi, i: (pi, i, 0)),
                  pl.BlockSpec((None, k, c), lambda pi, i: (pi, 0, 0)),
                  pl.BlockSpec((1, c), lambda pi, i: (0, 0))],
        out_specs=pl.BlockSpec((None, tm, c), lambda pi, i: (pi, i, 0)),
        compiler_params=pltpu.CompilerParams(
            dimension_semantics=("parallel", "parallel")),
        cost_estimate=cost,
    )(a, b, bias)


def affine_relu(y, scale, shift, tm_cap=2048):
    r, c = y.shape
    tm = _pick_tile(r, tm_cap)
    return pl.pallas_call(
        bn_relu_kernel,
        out_shape=jax.ShapeDtypeStruct((r, c), jnp.float32),
        grid=(r // tm,),
        in_specs=[pl.BlockSpec((tm, c), lambda i: (i, 0)),
                  pl.BlockSpec((1, c), lambda i: (0, 0)),
                  pl.BlockSpec((1, c), lambda i: (0, 0))],
        out_specs=pl.BlockSpec((tm, c), lambda i: (i, 0)),
        compiler_params=pltpu.CompilerParams(dimension_semantics=("parallel",)),
    )(y, scale, shift)


# ----------------------------------------------------------------------------
# Sub-pixel decomposition of ConvTranspose2d(k=4, s=2, p=1)  (JAX glue)
# ----------------------------------------------------------------------------
def _subpixel_patches(x_nhwc):
    """4-phase patch matrices.  x: (N,H,W,C) -> (4, N*H*W, 4*C), (N,H,W)."""
    n, h, w, c = x_nhwc.shape
    xp = jnp.pad(x_nhwc, ((0, 0), (1, 1), (1, 1), (0, 0)))
    phases = []
    for py in range(2):
        for px in range(2):
            taps = [xp[:, py + dy:py + dy + h, px + dx:px + dx + w, :]
                    for dy in range(2) for dx in range(2)]
            patch = jnp.stack(taps, axis=3)                      # (N,H,W,4,C)
            phases.append(patch.reshape(n * h * w, 4 * c))
    return jnp.stack(phases, axis=0), (n, h, w)


def _subpixel_weight(w, cin_pad, cout_pad):
    """(cin, cout, 4, 4) PyTorch ConvTranspose2d weight -> (4, 4*cin_pad, cout_pad)."""
    cin, cout = w.shape[0], w.shape[1]
    wp = jnp.zeros((cin_pad, cout_pad, 4, 4), jnp.float32).at[:cin, :cout].set(w)
    mats = []
    for py in range(2):
        for px in range(2):
            sub = wp[:, :, jnp.array(_TAPS[py]), :][:, :, :, jnp.array(_TAPS[px])]
            mats.append(sub.transpose(2, 3, 0, 1).reshape(4 * cin_pad, cout_pad))
    return jnp.stack(mats, axis=0)


def _layer1_weight(w, cout_pad):
    """(cin, cout, 4, 4) -> (cin, 16*cout_pad), column order (ky, kx, o)."""
    cin, cout = w.shape[0], w.shape[1]
    wt = jnp.zeros((cin, 4, 4, cout_pad), jnp.float32)
    wt = wt.at[..., :cout].set(w.transpose(0, 2, 3, 1))
    return wt.reshape(cin, 16 * cout_pad)


def _reassemble(y, n, h, w, cout):
    """(4, N*H*W, C_pad) phase outputs -> (N, 2H, 2W, cout) NHWC."""
    c_pad = y.shape[-1]
    y6 = y.reshape(2, 2, n, h, w, c_pad)[..., :cout]
    return y6.transpose(2, 3, 0, 4, 1, 5).reshape(n, 2 * h, 2 * w, cout)


def _bn_scale_shift(s, count, gamma, beta, eps=_EPS):
    mean = s[0] / count
    # clamp: E[y^2] - mean^2 can go slightly negative from cancellation
    var = jnp.maximum(s[1] / count - mean * mean, 0.0)
    inv = jax.lax.rsqrt(var + eps)
    scale = gamma * inv
    shift = beta - mean * scale
    return scale[None, :], shift[None, :]


# ----------------------------------------------------------------------------
# Generator layers
# ----------------------------------------------------------------------------
def block1(h0, wmat, gamma, beta):
    """ConvT(cin, cout, 4, 1, 0) on 1x1 input -> BN -> ReLU.  Returns (N,4,4,C_pad)."""
    n, cin = h0.shape
    c_pad = wmat.shape[1] // 16
    n_pad = max(8, _round_up(n, 8))                      # keep MXU rows aligned
    a = jnp.zeros((1, n_pad, cin), jnp.float32).at[0, :n].set(h0)
    y, s = mm_stats(a, wmat[None])                       # zero rows don't affect stats
    y = y[0, :n].reshape(n * 16, c_pad)                  # (N*4*4, C_pad) NHWC rows
    s = s.sum(axis=(0, 1)).reshape(2, 16, c_pad).sum(axis=1)
    scale, shift = _bn_scale_shift(s, n * 16, gamma, beta)
    return affine_relu(y, scale, shift).reshape(n, 4, 4, c_pad)


def block_s2(x, wmats, gamma, beta):
    """ConvT(k=4,s=2,p=1,bias=False) -> BN -> ReLU.  NHWC in/out, channels padded."""
    patches, (n, h, w) = _subpixel_patches(x)
    y, s = mm_stats(patches, wmats)                      # (4,R,Cp), (4,nt,2,Cp)
    r, c_pad = y.shape[1], y.shape[2]
    scale, shift = _bn_scale_shift(s.sum(axis=(0, 1)), 4 * r, gamma, beta)
    z = affine_relu(y.reshape(4 * r, c_pad), scale, shift).reshape(4, r, c_pad)
    return _reassemble(z, n, h, w, c_pad)


def final_s2(x, wmats, bias, cout):
    """ConvT(k=4,s=2,p=1,bias=True) -> Tanh, tanh/bias fused into the matmul."""
    patches, (n, h, w) = _subpixel_patches(x)
    y = mm_bias_tanh(patches, wmats, bias)
    return _reassemble(y, n, h, w, cout)


# ----------------------------------------------------------------------------
# Parameter preparation + forward
# ----------------------------------------------------------------------------
def _pad_vec(v, c_pad):
    return jnp.zeros((c_pad,), jnp.float32).at[:v.shape[0]].set(v)


def prepare_params(params):
    """One-time conversion of PyTorch-layout params into matmul-ready matrices."""
    prep = {"embed": params["embed"]}
    cp = _round_up(params["w1"].shape[1])
    prep["w1m"] = _layer1_weight(params["w1"], cp)
    prep["g1"], prep["b1"] = _pad_vec(params["g1"], cp), _pad_vec(params["b1"], cp)
    cin_pad = cp
    for i in (2, 3, 4):
        w = params[f"w{i}"]
        cp = _round_up(w.shape[1])
        prep[f"w{i}m"] = _subpixel_weight(w, cin_pad, cp)
        prep[f"g{i}"] = _pad_vec(params[f"g{i}"], cp)
        prep[f"b{i}"] = _pad_vec(params[f"b{i}"], cp)
        cin_pad = cp
    cp = _round_up(params["w5"].shape[1])
    prep["w5m"] = _subpixel_weight(params["w5"], cin_pad, cp)
    prep["bias5"] = _pad_vec(params["bias5"], cp)[None, :]
    return prep


def generator_forward(prep, x, labels, channels_img):
    emb = jnp.take(prep["embed"], labels, axis=0)                     # (N, E)
    h0 = jnp.concatenate([x.reshape(x.shape[0], -1), emb], axis=1)    # (N, z+E)
    h = block1(h0, prep["w1m"], prep["g1"], prep["b1"])               # (N, 4, 4, Cp)
    h = block_s2(h, prep["w2m"], prep["g2"], prep["b2"])              # (N, 8, 8, Cp)
    h = block_s2(h, prep["w3m"], prep["g3"], prep["b3"])              # (N,16,16, Cp)
    h = block_s2(h, prep["w4m"], prep["g4"], prep["b4"])              # (N,32,32, Cp)
    out = final_s2(h, prep["w5m"], prep["bias5"], channels_img)       # (N,64,64, C)
    return out.transpose(0, 3, 1, 2)                                  # NCHW


def init_params(key, z_dim, embed_size, features_g, channels_img, num_classes):
    ks = jax.random.split(key, 12)
    fg = features_g
    c_in = z_dim + embed_size

    def w(k, cin, cout):
        return 0.05 * jax.random.normal(k, (cin, cout, 4, 4), jnp.float32)

    return {
        "embed": jax.random.normal(ks[0], (num_classes, embed_size), jnp.float32),
        "w1": w(ks[1], c_in, fg * 16),
        "g1": jnp.ones((fg * 16,), jnp.float32) + 0.1 * jax.random.normal(ks[2], (fg * 16,)),
        "b1": 0.1 * jax.random.normal(ks[3], (fg * 16,), jnp.float32),
        "w2": w(ks[4], fg * 16, fg * 8),
        "g2": jnp.ones((fg * 8,), jnp.float32),
        "b2": jnp.zeros((fg * 8,), jnp.float32),
        "w3": w(ks[5], fg * 8, fg * 4),
        "g3": jnp.ones((fg * 4,), jnp.float32),
        "b3": jnp.zeros((fg * 4,), jnp.float32),
        "w4": w(ks[6], fg * 4, fg * 2),
        "g4": jnp.ones((fg * 2,), jnp.float32),
        "b4": jnp.zeros((fg * 2,), jnp.float32),
        "w5": w(ks[7], fg * 2, channels_img),
        "bias5": 0.1 * jax.random.normal(ks[8], (channels_img,), jnp.float32),
    }


# ----------------------------------------------------------------------------
# Pure-JAX reference (for correctness checks)
# ----------------------------------------------------------------------------
def _convT_ref(x, w, stride, padding):
    k = w.shape[2]
    w_eq = jnp.flip(w, (2, 3)).transpose(1, 0, 2, 3)      # (cout, cin, k, k)
    pe = k - 1 - padding
    return jax.lax.conv_general_dilated(
        x, w_eq, window_strides=(1, 1), padding=[(pe, pe), (pe, pe)],
        lhs_dilation=(stride, stride),
        dimension_numbers=("NCHW", "OIHW", "NCHW"))


def _ref_block(x, w, gamma, beta, stride, padding, eps=_EPS):
    y = _convT_ref(x, w, stride, padding)
    mean = y.mean(axis=(0, 2, 3), keepdims=True)
    var = y.var(axis=(0, 2, 3), keepdims=True)            # biased, BN training mode
    yn = (y - mean) * jax.lax.rsqrt(var + eps)
    return jnp.maximum(yn * gamma[None, :, None, None] + beta[None, :, None, None], 0.0)


def _ref_forward(params, x, labels):
    emb = jnp.take(params["embed"], labels, axis=0)[:, :, None, None]
    h = jnp.concatenate([x, emb], axis=1)
    h = _ref_block(h, params["w1"], params["g1"], params["b1"], 1, 0)
    h = _ref_block(h, params["w2"], params["g2"], params["b2"], 2, 1)
    h = _ref_block(h, params["w3"], params["g3"], params["b3"], 2, 1)
    h = _ref_block(h, params["w4"], params["g4"], params["b4"], 2, 1)
    y = _convT_ref(h, params["w5"], 2, 1) + params["bias5"][None, :, None, None]
    return jnp.tanh(y)


if __name__ == "__main__":
    N = 2
    z_dim, embed_size, features_g, channels_img, num_classes = 8, 8, 4, 3, 4
    # img_size is stored but unused by the forward; architecture fixes 64x64 output.

    key = jax.random.PRNGKey(0)
    k_param, k_x, k_lab, k_t1, k_t2 = jax.random.split(key, 5)
    params = init_params(k_param, z_dim, embed_size, features_g, channels_img,
                         num_classes)
    prep = prepare_params(params)

    x = jax.random.normal(k_x, (N, z_dim, 1, 1), jnp.float32)
    labels = jax.random.randint(k_lab, (N,), 0, num_classes)

    # --- Unit check 1: layer-1 (1x1 input, stride 1, pad 0) matmul vs einsum. ---
    h0 = jnp.concatenate([x[:, :, 0, 0], jnp.take(params["embed"], labels, axis=0)],
                         axis=1)
    cp1 = _round_up(features_g * 16)
    a1 = jnp.zeros((1, 8, h0.shape[1]), jnp.float32).at[0, :N].set(h0)
    y1, _ = mm_stats(a1, prep["w1m"][None])
    mine1 = y1[0, :N].reshape(N, 4, 4, cp1)[..., :features_g * 16]
    ref1 = jnp.einsum("nc,cohw->nhwo", h0, params["w1"])
    assert jnp.allclose(mine1, ref1, atol=1e-2, rtol=1e-2), "layer-1 convT mismatch"

    # --- Unit check 2: sub-pixel decomposition of a stride-2 transposed conv. ---
    xt = jax.random.normal(k_t1, (2, 12, 4, 4), jnp.float32)          # NCHW
    wt = 0.1 * jax.random.normal(k_t2, (12, 7, 4, 4), jnp.float32)    # (cin,cout,k,k)
    patches, (tn, th, tw) = _subpixel_patches(xt.transpose(0, 2, 3, 1))
    yt, _ = mm_stats(patches, _subpixel_weight(wt, 12, _round_up(7)))
    mine2 = _reassemble(yt, tn, th, tw, 7).transpose(0, 3, 1, 2)
    ref2 = _convT_ref(xt, wt, 2, 1)
    assert jnp.allclose(mine2, ref2, atol=1e-2, rtol=1e-2), "stride-2 convT mismatch"

    # --- Full forward vs. pure-JAX reference (ConvT + batch-stat BN + ReLU/Tanh). ---
    fwd = jax.jit(functools.partial(generator_forward, channels_img=channels_img))
    out = jax.block_until_ready(fwd(prep, x, labels))
    ref_out = _ref_forward(params, x, labels)

    assert out.shape == (N, channels_img, 64, 64)
    assert bool(jnp.all(jnp.isfinite(out)))
    assert bool(jnp.all(jnp.abs(out) <= 1.0 + 1e-6))     # tanh output range
    # Loose tolerance: both sides use default (bf16-pass) MXU precision on TPU.
    assert jnp.allclose(out, ref_out, atol=3e-2, rtol=3e-2), (
        "forward mismatch, max abs diff = %f" % float(jnp.max(jnp.abs(out - ref_out))))
    print("KERNEL_OK")
</pallas_src>

<mosaic_0001>
module attributes {stable_mosaic.version = 11 : i64} {
  func.func @mm_stats_kernel(%arg0: i32, %arg1: i32, %arg2: memref<1x8x16xf32, #tpu.memory_space<vmem>>, %arg3: memref<1x16x2048xf32, #tpu.memory_space<vmem>>, %arg4: memref<1x8x2048xf32, #tpu.memory_space<vmem>>, %arg5: memref<1x1x2x2048xf32, #tpu.memory_space<vmem>>) attributes {dimension_semantics = [#tpu.dimension_semantics<parallel>, #tpu.dimension_semantics<parallel>], iteration_bounds = array<i64: 1, 1>, scalar_prefetch = 0 : i64, scratch_operands = 0 : i64, tpu.core_type = #tpu.core_type<tc>, window_params = [{transform_indices = @transform_0, window_bounds = array<i64: 1, 8, 16>}, {transform_indices = @transform_1, window_bounds = array<i64: 1, 16, 2048>}, {transform_indices = @transform_2, window_bounds = array<i64: 1, 8, 2048>}, {transform_indices = @transform_3, window_bounds = array<i64: 1, 1, 2, 2048>}]} {
    %c0 = arith.constant 0 : index
    %c0_0 = arith.constant 0 : index
    %c0_1 = arith.constant 0 : index
    %0 = vector.load %arg2[%c0, %c0_0, %c0_1] : memref<1x8x16xf32, #tpu.memory_space<vmem>>, vector<1x8x16xf32>
    %1 = vector.shape_cast %0 : vector<1x8x16xf32> to vector<8x16xf32>
    %c0_2 = arith.constant 0 : index
    %c0_3 = arith.constant 0 : index
    %c0_4 = arith.constant 0 : index
    %2 = vector.load %arg3[%c0_2, %c0_3, %c0_4] : memref<1x16x2048xf32, #tpu.memory_space<vmem>>, vector<1x16x2048xf32>
    %3 = vector.shape_cast %2 : vector<1x16x2048xf32> to vector<16x2048xf32>
    %cst = arith.constant dense<0.000000e+00> : vector<8x2048xf32>
    %4 = tpu.matmul %1, %3, %cst {dimension_numbers = #tpu.dot_dimension_numbers<[1], [0], [0], [1], [0, 0, 1, 1], [], []>} : vector<8x16xf32>, vector<16x2048xf32>, vector<8x2048xf32> -> vector<8x2048xf32>
    %c0_5 = arith.constant 0 : index
    %c0_6 = arith.constant 0 : index
    %c0_7 = arith.constant 0 : index
    %5 = vector.load %arg4[%c0_5, %c0_6, %c0_7] : memref<1x8x2048xf32, #tpu.memory_space<vmem>>, vector<1x8x2048xf32>
    %6 = vector.shape_cast %5 : vector<1x8x2048xf32> to vector<8x2048xf32>
    %7 = vector.shape_cast %4 : vector<8x2048xf32> to vector<1x8x2048xf32>
    tpu.vector_store %arg4[%c0_5, %c0_6, %c0_7], %7 {strides = array<i32>} : memref<1x8x2048xf32, #tpu.memory_space<vmem>>, vector<1x8x2048xf32>,
    %cst_8 = arith.constant dense<0.000000e+00> : vector<2048xf32>
    %8 = vector.multi_reduction <add>, %4, %cst_8 [0] : vector<8x2048xf32> to vector<2048xf32>
    %9 = vector.shape_cast %8 : vector<2048xf32> to vector<1x2048xf32>
    %10 = arith.mulf %4, %4 : vector<8x2048xf32>
    %cst_9 = arith.constant dense<0.000000e+00> : vector<2048xf32>
    %11 = vector.multi_reduction <add>, %10, %cst_9 [0] : vector<8x2048xf32> to vector<2048xf32>
    %12 = vector.shape_cast %11 : vector<2048xf32> to vector<1x2048xf32>
    %13 = tpu.concatenate %9, %12 in 0 : vector<1x2048xf32>, vector<1x2048xf32> -> vector<2x2048xf32>
    %c0_10 = arith.constant 0 : index
    %c0_11 = arith.constant 0 : index
    %c0_12 = arith.constant 0 : index
    %c0_13 = arith.constant 0 : index
    %14 = vector.load %arg5[%c0_10, %c0_11, %c0_12, %c0_13] : memref<1x1x2x2048xf32, #tpu.memory_space<vmem>>, vector<1x1x2x2048xf32>
    %15 = vector.shape_cast %14 : vector<1x1x2x2048xf32> to vector<2x2048xf32>
    %16 = vector.shape_cast %13 : vector<2x2048xf32> to vector<1x1x2x2048xf32>
    tpu.vector_store %arg5[%c0_10, %c0_11, %c0_12, %c0_13], %16 {strides = array<i32>} : memref<1x1x2x2048xf32, #tpu.memory_space<vmem>>, vector<1x1x2x2048xf32>,
    return
  }
  func.func @transform_0(%arg0: i32, %arg1: i32) -> (i32, i32, i32) {
    %c0_i32 = arith.constant 0 : i32
    %c0_i32_0 = arith.constant 0 : i32
    return %arg0, %arg1, %c0_i32 : i32, i32, i32
  }
  func.func @transform_1(%arg0: i32, %arg1: i32) -> (i32, i32, i32) {
    %c0_i32 = arith.constant 0 : i32
    %c0_i32_0 = arith.constant 0 : i32
    %c0_i32_1 = arith.constant 0 : i32
    return %arg0, %c0_i32, %c0_i32_0 : i32, i32, i32
  }
  func.func @transform_2(%arg0: i32, %arg1: i32) -> (i32, i32, i32) {
    %c0_i32 = arith.constant 0 : i32
    %c0_i32_0 = arith.constant 0 : i32
    return %arg0, %arg1, %c0_i32 : i32, i32, i32
  }
  func.func @transform_3(%arg0: i32, %arg1: i32) -> (i32, i32, i32, i32) {
    %c0_i32 = arith.constant 0 : i32
    %c0_i32_0 = arith.constant 0 : i32
    %c0_i32_1 = arith.constant 0 : i32
    return %arg0, %arg1, %c0_i32, %c0_i32_0 : i32, i32, i32, i32
  }
}

</mosaic_0001>

<bundles_post_ra>
// kernel: tpu_custom_call.1
= control target key start
LH: loop header
LB: loop body
LE: loop exit
PB: predicated region body
PF: predicated region fallthrough
CT: control target
= control target key end

     0   :  { %9 = vsyncpa [#allocation3], 0  ;;  %s1417_s0 = inlined_call_operand.hbm [shape: f32[1,8,16], index: 0, kind: input, shape index: {}]   ;;  %s1418_s1 = inlined_call_operand.hbm [shape: f32[1,16,2048], index: 1, kind: input, shape index: {}]   ;;  %s1419_s2 = inlined_call_operand.hbm [shape: f32[1,8,2048], index: 2, kind: output, shape index: {0}]   ;;  %s1420_s3 = inlined_call_operand.hbm [shape: f32[1,1,2,2048], index: 3, kind: output, shape index: {1}]  }
   0x1   :  { %10 = vsyncpa [#allocation6], 0 }
   0x2   :  { %11 = vsyncpa [#allocation4], 0 }
   0x3   :  { %12 = vsyncpa [#allocation9], 0  ;;  %s1153_s12 = smov [#allocation2]   ;;  %s1154_s14 = smov [#allocation5]  }
   0x4   :  { %s19_s13 = sshll.u32 %s1153_s12, 4  ;;  %s28_s15 = sshll.u32 %s1154_s14, 4  ;;  %s20_s13 = int_to_ptr.vmem [resolvable:$true] %s19_s13  ;;  %s1181_s15 = int_to_ptr.vmem [resolvable:$true] %s28_s15 }
   0x5   :  { %s1057_s18 = scalar_lea.hbm %s1417_s0, 128 }
   0x6   :  { %p1058_p0 = scmp.ne.s32.totalorder %s1417_s0, %s1057_s18  ;;  %p1061_p1 = scmp.lt.u32.totalorder %s1057_s18, %s1417_s0 }
   0x8   :  { %p1063_p2 = pnand %p1061_p1, %p1058_p0 }
   0xa   :  { %1066 = shalt.err (!%p1063_p2)
}
   0xb   :  { %s1067_s23 = scalar_lea.vmem %s20_s13, 128  ;;  %p1072_p4 = scmp.lt.s32.totalorder %s20_s13, %s20_s13 }
   0xc   :  { %p1068_p3 = scmp.ne.s32.totalorder %s20_s13, %s1067_s23  ;;  %p1073_p5 = scmp.lt.s32.totalorder %s1067_s23, %s1067_s23 }
   0xe   :  { %p1074_p6 = por %p1073_p5, %p1072_p4 }
  0x10   :  { %p1075_p7 = pnand %p1074_p6, %p1068_p3 }
  0x12   :  { %1078 = shalt.err (!%p1075_p7)
}
  0x13   :  { %22 = dma.hbm_to_vmem [thread:$0]  %s1417_s0, 128, %s20_s13, [#allocation3]  }
  0x14   :  { %s1079_s28 = scalar_lea.hbm %s1418_s1, 4096 }
  0x15   :  { %p1080_p8 = scmp.ne.s32.totalorder %s1418_s1, %s1079_s28  ;;  %p1083_p9 = scmp.lt.u32.totalorder %s1079_s28, %s1418_s1 }
  0x17   :  { %p1085_p10 = pnand %p1083_p9, %p1080_p8 }
  0x19   :  { %1088 = shalt.err (!%p1085_p10)
}
  0x1a   :  { %s1089_s6 = scalar_lea.vmem %s1181_s15, 4096  ;;  %p1094_p12 = scmp.lt.s32.totalorder %s1181_s15, %s1181_s15 }
  0x1b   :  { %p1090_p11 = scmp.ne.s32.totalorder %s1181_s15, %s1089_s6  ;;  %p1095_p13 = scmp.lt.s32.totalorder %s1089_s6, %s1089_s6 }
  0x1d   :  { %p1096_p0 = por %p1095_p13, %p1094_p12 }
  0x1f   :  { %p1097_p1 = pnand %p1096_p0, %p1090_p11 }
  0x21   :  { %1100 = shalt.err (!%p1097_p1)
}
  0x22   :  { %s1155_s0 = smov 2048   ;;  %s1156_s7 = smov 128  }
  0x23   :  { %34 = dma.hbm_to_vmem [thread:$0]  %s1418_s1, 4096, %s1181_s15, [#allocation6], %s1155_s0, %s1155_s0, %s1156_s7  }
  0x24   :  { %1145 = dma.done.wait [#allocation3], 128  }
  0x25   :  { %1146 = vsyncadd [#allocation3], 4294967168 }
  0x26   :  { %1147 = dma.done.wait [#allocation6], 4096  }
  0x27   :  { %1148 = vsyncadd [#allocation6], 4294963200  ;;  %v1157_v0 = vmov 0.0   ;;  %v43_v1 = vld [vmem:[#allocation5 + $0x8] sm:$0xff]  ;;  %v45_v3 = vld [vmem:[#allocation5 + $0x18] sm:$0xff]  ;;  %vm74_vm0 = vcmask 130048   ;;  %v908_v52 = vlaneseq }
  0x28   :  { %142 = vmatprep.mubr.f32.mxu0 %v1157_v0  ;;  %213 = vmatprep.mubr.f32.mxu1 %v1157_v0  ;;  %v59_v2 = vld [vmem:[#allocation5 + $0x88] sm:$0xff]  ;;  %v61_v5 = vld [vmem:[#allocation5 + $0x98] sm:$0xff]  ;;  %v42_v6 = vld [vmem:[#allocation5] sm:$0xff]  ;;  %v1158_v50 = vmov 1983009808   ;;  %s1159_s1 = smov [#allocation7]  }
  0x29   :  { %v1017_v4 = vpack.c.bf16 %v59_v2, %v43_v1  ;;  %v58_v7 = vld [vmem:[#allocation5 + $0x80] sm:$0xff]  ;;  %v1021_v8 = vpack.c.bf16 %v61_v5, %v45_v3  ;;  %v44_v10 = vld [vmem:[#allocation5 + $0x10] sm:$0xff]  ;;  %v1214_v12 = vld [vmem:[#allocation2] sm:$0xff]  ;;  %v1238_v51 = vunpack.c.l.s4 %v1158_v50  ;;  %v1241_v59 = vshrl.u32 %v908_v52, 7  ;;  %s985_s10 = sshll.u32 %s1159_s1, 4  ;;  %s1280_s10 = int_to_ptr.vmem [resolvable:$true] %s985_s10 }
  0x2a   :  { %v1019_v9 = vpack.c.bf16 %v58_v7, %v42_v6  ;;  %v60_v11 = vld [vmem:[#allocation5 + $0x90] sm:$0xff]  ;;  %v47_v14 = vld [vmem:[#allocation5 + $0x28] sm:$0xff]  ;;  %v49_v16 = vld [vmem:[#allocation5 + $0x38] sm:$0xff]  ;;  %vm870_vm1 = vcmask 1040384   ;;  %s1101_s11 = scalar_lea.vmem %s1280_s10, 2048  ;;  %p1106_p3 = scmp.lt.s32.totalorder %s1280_s10, %s1280_s10 }
  0x2b   :  { %1018 = vmatprep.subr.bf16.mxu0 %v1017_v4  ;;  %v1023_v13 = vpack.c.bf16 %v60_v11, %v44_v10  ;;  %v63_v15 = vld [vmem:[#allocation5 + $0xa8] sm:$0xff]  ;;  %1022 = vmatprep.subr.bf16.mxu1 %v1021_v8  ;;  %v65_v18 = vld [vmem:[#allocation5 + $0xb8] sm:$0xff]  ;;  %v46_v19 = vld [vmem:[#allocation5 + $0x20] sm:$0xff]  ;;  %v907_v58 = vunpack.c.0.s8 %v1238_v51  ;;  %p1102_p2 = scmp.ne.s32.totalorder %s1280_s10, %s1101_s11  ;;  %p1107_p4 = scmp.lt.s32.totalorder %s1101_s11, %s1101_s11 }
  0x2c   :  { %1020 = vmatpush1.bf16.msra.mxu0 %v1019_v9  ;;  %v1025_v17 = vpack.c.bf16 %v63_v15, %v47_v14  ;;  %v62_v20 = vld [vmem:[#allocation5 + $0xa0] sm:$0xff]  ;;  %v1029_v21 = vpack.c.bf16 %v65_v18, %v49_v16  ;;  %v48_v23 = vld [vmem:[#allocation5 + $0x30] sm:$0xff]  ;;  %v51_v25 = vld [vmem:[#allocation5 + $0x48] sm:$0xff] }
  0x2d   :  { %1024 = vmatpush1.bf16.msra.mxu1 %v1023_v13  ;;  %v1027_v22 = vpack.c.bf16 %v62_v20, %v46_v19  ;;  %v64_v24 = vld [vmem:[#allocation5 + $0xb0] sm:$0xff]  ;;  %v67_v27 = vld [vmem:[#allocation5 + $0xc8] sm:$0xff]  ;;  %v53_v28 = vld [vmem:[#allocation5 + $0x58] sm:$0xff]  ;;  %p1108_p5 = por %p1107_p4, %p1106_p3 }
  0x2e   :  { %1026 = vmatprep.subr.bf16.mxu0 %v1025_v17  ;;  %v1031_v26 = vpack.c.bf16 %v64_v24, %v48_v23  ;;  %v69_v29 = vld [vmem:[#allocation5 + $0xd8] sm:$0xff]  ;;  %1030 = vmatprep.subr.bf16.mxu1 %v1029_v21  ;;  %v1033_v30 = vpack.c.bf16 %v67_v27, %v51_v25  ;;  %v50_v32 = vld [vmem:[#allocation5 + $0x40] sm:$0xff]  ;;  %v52_v34 = vld [vmem:[#allocation5 + $0x50] sm:$0xff] }
  0x2f   :  { %1009 = vmatmul.mubr.msk.f32.vlgmr.msra.gmra.mrb[0].mxu0 %vm74_vm0, %v1214_v12  ;;  %v1037_v31 = vpack.c.bf16 %v69_v29, %v53_v28  ;;  %v66_v33 = vld [vmem:[#allocation5 + $0xc0] sm:$0xff]  ;;  %v68_v36 = vld [vmem:[#allocation5 + $0xd0] sm:$0xff]  ;;  %v55_v37 = vld [vmem:[#allocation5 + $0x68] sm:$0xff]  ;;  %p1109_p6 = pnand %p1108_p5, %p1102_p2 }
  0x30   :  { %1010 = vmatmul.mubr.msk.f32.vlgmr.msra.gmra.mrb[0].mxu1 %vm74_vm0, %v1214_v12  ;;  %1028 = vmatpush1.bf16.msra.mxu0 %v1027_v22  ;;  %v1035_v35 = vpack.c.bf16 %v66_v33, %v50_v32  ;;  %v71_v38 = vld [vmem:[#allocation5 + $0xe8] sm:$0xff]  ;;  %v1039_v39 = vpack.c.bf16 %v68_v36, %v52_v34  ;;  %v57_v40 = vld [vmem:[#allocation5 + $0x78] sm:$0xff]  ;;  %v54_v42 = vld [vmem:[#allocation5 + $0x60] sm:$0xff] }
  0x31   :  { %1032 = vmatpush1.bf16.msra.mxu1 %v1031_v26  ;;  %284 = vmatprep.mubr.f32.mxu0 %v1157_v0  ;;  %v73_v41 = vld [vmem:[#allocation5 + $0xf8] sm:$0xff]  ;;  %v1041_v43 = vpack.c.bf16 %v71_v38, %v55_v37  ;;  %v70_v44 = vld [vmem:[#allocation5 + $0xe0] sm:$0xff]  ;;  %v56_v45 = vld [vmem:[#allocation5 + $0x70] sm:$0xff] }
  0x32   :  { %355 = vmatprep.mubr.f32.mxu1 %v1157_v0  ;;  %1034 = vmatprep.subr.bf16.mxu0 %v1033_v30  ;;  %v72_v46 = vld [vmem:[#allocation5 + $0xf0] sm:$0xff]  ;;  %v1045_v47 = vpack.c.bf16 %v73_v41, %v57_v40  ;;  %v1043_v48 = vpack.c.bf16 %v70_v44, %v54_v42 }
  0x33   :  { %1011 = vmatmul.mubr.msk.f32.vlgmr.msra.gmra.mrb[2].mxu0 %vm74_vm0, %v1214_v12  ;;  %1038 = vmatprep.subr.bf16.mxu1 %v1037_v31  ;;  %v1047_v49 = vpack.c.bf16 %v72_v46, %v56_v45 }
  0x34   :  { %1012 = vmatmul.mubr.msk.f32.vlgmr.msra.gmra.mrb[2].mxu1 %vm74_vm0, %v1214_v12  ;;  %1036 = vmatpush1.bf16.msra.mxu0 %v1035_v35 }
  0x35   :  { %1040 = vmatpush1.bf16.msra.mxu1 %v1039_v39  ;;  %426 = vmatprep.mubr.f32.mxu0 %v1157_v0 }
  0x36   :  { %497 = vmatprep.mubr.f32.mxu1 %v1157_v0  ;;  %1042 = vmatprep.subr.bf16.mxu0 %v1041_v43 }
  0x37   :  { %1013 = vmatmul.mubr.msk.f32.vlgmr.msra.gmra.mrb[4].mxu0 %vm74_vm0, %v1214_v12  ;;  %1046 = vmatprep.subr.bf16.mxu1 %v1045_v47 }
  0x38   :  { %1014 = vmatmul.mubr.msk.f32.vlgmr.msra.gmra.mrb[4].mxu1 %vm74_vm0, %v1214_v12  ;;  %1044 = vmatpush1.bf16.msra.mxu0 %v1043_v48  ;;  %v1272_v48 = vsub.s32 %v907_v58, %v1241_v59 }
  0x39   :  { %1048 = vmatpush1.bf16.msra.mxu1 %v1047_v49  ;;  %568 = vmatprep.mubr.f32.mxu0 %v1157_v0 }
  0x3a   :  { %639 = vmatprep.mubr.f32.mxu1 %v1157_v0 }
  0x3b   :  { %1015 = vmatmul.mubr.msk.f32.vlgmr.msra.gmra.mrb[6].mxu0 %vm74_vm0, %v1214_v12 }
  0x3c   :  { %1016 = vmatmul.mubr.msk.f32.vlgmr.msra.gmra.mrb[6].mxu1 %vm74_vm0, %v1214_v12 }
 0x102   :  { %v144_v53 = vpop.f32.mrb[0].mxu0 }
 0x103   :  { %646 = vst [vmem:[#allocation7] sm:$0xff] %v144_v53  ;;  %v662_v54 = vrot.slane %v144_v53, 4  ;;  %v758_v55 = vmul.f32 %v144_v53, %v144_v53  ;;  %v215_v56 = vpop.f32.mrb[0].mxu1  ;;  %v146_v57 = vpop.f32.mrb[1].mxu0 }
 0x104   :  { %648 = vst [vmem:[#allocation7 + $0x10] sm:$0xff] %v215_v56  ;;  %v674_v60 = vrot.slane %v215_v56, 4  ;;  %v760_v61 = vmul.f32 %v215_v56, %v215_v56  ;;  %647 = vst [vmem:[#allocation7 + $0x8] sm:$0xff] %v146_v57  ;;  %v668_v62 = vrot.slane %v146_v57, 4  ;;  %v759_v63 = vmul.f32 %v146_v57, %v146_v57  ;;  %v217_v0 = vpop.f32.mrb[1].mxu1 }
 0x105   :  { %v663_v1 = vadd.f32 %v662_v54, %v144_v53  ;;  %v774_v2 = vrot.slane %v758_v55, 4  ;;  %649 = vst [vmem:[#allocation7 + $0x18] sm:$0xff] %v217_v0  ;;  %v680_v3 = vrot.slane %v217_v0, 4  ;;  %v761_v4 = vmul.f32 %v217_v0, %v217_v0 }
 0x106   :  { %v675_v5 = vadd.f32 %v674_v60, %v215_v56  ;;  %v786_v6 = vrot.slane %v760_v61, 4  ;;  %v669_v7 = vadd.f32 %v668_v62, %v146_v57  ;;  %v780_v8 = vrot.slane %v759_v63, 4  ;;  %v1243_v9 = vpop.f32.mrb[2].mxu0 }
 0x107   :  { %v664_v10 = vrot.slane %v663_v1, 2  ;;  %v775_v11 = vadd.f32 %v774_v2, %v758_v55  ;;  %v681_v12 = vadd.f32 %v680_v3, %v217_v0  ;;  %v792_v13 = vrot.slane %v761_v4, 4  ;;  %650 = vst [vmem:[#allocation7 + $0x20] sm:$0xff] %v1243_v9  ;;  %v1246_v14 = vpop.f32.mrb[2].mxu1  ;;  %v1248_v15 = vpop.f32.mrb[3].mxu0 }
 0x108   :  { %v676_v16 = vrot.slane %v675_v5, 2  ;;  %v787_v17 = vadd.f32 %v786_v6, %v760_v61  ;;  %v670_v18 = vrot.slane %v669_v7, 2  ;;  %v781_v19 = vadd.f32 %v780_v8, %v759_v63  ;;  %652 = vst [vmem:[#allocation7 + $0x30] sm:$0xff] %v1246_v14  ;;  %651 = vst [vmem:[#allocation7 + $0x28] sm:$0xff] %v1248_v15  ;;  %v1252_v20 = vpop.f32.mrb[3].mxu1 }
 0x109   :  { %v665_v21 = vadd.f32 %v664_v10, %v663_v1  ;;  %v776_v22 = vrot.slane %v775_v11, 2  ;;  %v682_v23 = vrot.slane %v681_v12, 2  ;;  %v793_v24 = vadd.f32 %v792_v13, %v761_v4  ;;  %653 = vst [vmem:[#allocation7 + $0x38] sm:$0xff] %v1252_v20 }
 0x10a   :  { %v677_v25 = vadd.f32 %v676_v16, %v675_v5  ;;  %v788_v26 = vrot.slane %v787_v17, 2  ;;  %v671_v27 = vadd.f32 %v670_v18, %v669_v7  ;;  %v782_v28 = vrot.slane %v781_v19, 2  ;;  %v1255_v29 = vpop.f32.mrb[4].mxu0 }
 0x10b   :  { %v666_v30 = vrot.slane %v665_v21, 1  ;;  %v777_v31 = vadd.f32 %v776_v22, %v775_v11  ;;  %v683_v32 = vadd.f32 %v682_v23, %v681_v12  ;;  %v794_v33 = vrot.slane %v793_v24, 2  ;;  %654 = vst [vmem:[#allocation7 + $0x40] sm:$0xff] %v1255_v29  ;;  %v1258_v34 = vpop.f32.mrb[4].mxu1  ;;  %v1260_v35 = vpop.f32.mrb[5].mxu0 }
 0x10c   :  { %v678_v36 = vrot.slane %v677_v25, 1  ;;  %v789_v37 = vadd.f32 %v788_v26, %v787_v17  ;;  %v672_v38 = vrot.slane %v671_v27, 1  ;;  %v783_v39 = vadd.f32 %v782_v28, %v781_v19  ;;  %656 = vst [vmem:[#allocation7 + $0x50] sm:$0xff] %v1258_v34  ;;  %655 = vst [vmem:[#allocation7 + $0x48] sm:$0xff] %v1260_v35  ;;  %v1264_v40 = vpop.f32.mrb[5].mxu1 }
 0x10d   :  { %v778_v41 = vrot.slane %v777_v31, 1  ;;  %v684_v42 = vrot.slane %v683_v32, 1  ;;  %v795_v43 = vadd.f32 %v794_v33, %v793_v24  ;;  %657 = vst [vmem:[#allocation7 + $0x58] sm:$0xff] %v1264_v40  ;;  %v667_v44 = vadd.f32 %v666_v30, %v665_v21 }
 0x10e   :  { %v790_v45 = vrot.slane %v789_v37, 1  ;;  %v784_v46 = vrot.slane %v783_v39, 1  ;;  %v1267_v47 = vpop.f32.mrb[6].mxu0  ;;  %v679_v50 = vadd.f32 %v678_v36, %v677_v25  ;;  %v686_v53 = vrot.slane %v1243_v9, 4 }
 0x10f   :  { %v779_v49 = vadd.f32 %v778_v41, %v777_v31  ;;  %v796_v52 = vrot.slane %v795_v43, 1  ;;  %658 = vst [vmem:[#allocation7 + $0x60] sm:$0xff] %v1267_v47  ;;  %v1276_v54 = vpop.f32.mrb[6].mxu1  ;;  %v1278_v55 = vpop.f32.mrb[7].mxu0  ;;  %v673_v57 = vadd.f32 %v672_v38, %v671_v27  ;;  %v762_v51 = vmul.f32 %v1243_v9, %v1243_v9 }
 0x110   :  { %v791_v56 = vadd.f32 %v790_v45, %v789_v37  ;;  %v698_v58 = vrot.slane %v1246_v14, 4  ;;  %660 = vst [vmem:[#allocation7 + $0x70] sm:$0xff] %v1276_v54  ;;  %659 = vst [vmem:[#allocation7 + $0x68] sm:$0xff] %v1278_v55  ;;  %v1287_v59 = vpop.f32.mrb[7].mxu1  ;;  %v785_v60 = vadd.f32 %v784_v46, %v783_v39  ;;  %v685_v61 = vadd.f32 %v684_v42, %v683_v32 }
 0x111   :  { %v687_v62 = vadd.f32 %v686_v53, %v1243_v9  ;;  %v764_v63 = vmul.f32 %v1246_v14, %v1246_v14  ;;  %661 = vst [vmem:[#allocation7 + $0x78] sm:$0xff] %v1287_v59  ;;  %v1294_v0 = vsel %vm870_vm1, %v667_v44, %v779_v49  ;;  %v797_v1 = vadd.f32 %v796_v52, %v795_v43 }
 0x112   :  { %v798_v2 = vrot.slane %v762_v51, 4  ;;  %v699_v3 = vadd.f32 %v698_v58, %v1246_v14 }
 0x113   :  { %1112 = shalt.err (!%p1109_p6)
}
 0x114   :  { %s1113_s14 = scalar_lea.hbm %s1419_s2, 2048 }
 0x115   :  { %p1114_p7 = scmp.ne.s32.totalorder %s1419_s2, %s1113_s14  ;;  %p1117_p8 = scmp.lt.u32.totalorder %s1113_s14, %s1419_s2 }
 0x117   :  { %p1119_p9 = pnand %p1117_p8, %p1114_p7 }
 0x119   :  { %1122 = shalt.err (!%p1119_p9)
}
 0x11a   :  { %988 = dma.vmem_to_hbm [thread:$0]  %s1280_s10, 2048, %s1419_s2, [#allocation4]   ;;  %v1315_v4 = vsel %vm870_vm1, %v679_v50, %v791_v56  ;;  %v688_v5 = vrot.slane %v687_v62, 2  ;;  %v810_v6 = vrot.slane %v764_v63, 4  ;;  %v692_v7 = vrot.slane %v1248_v15, 4 }
 0x11b   :  { %v799_v8 = vadd.f32 %v798_v2, %v762_v51  ;;  %v700_v9 = vrot.slane %v699_v3, 2  ;;  %v763_v10 = vmul.f32 %v1248_v15, %v1248_v15  ;;  %v704_v11 = vrot.slane %v1252_v20, 4  ;;  %s1160_s2 = smov [#allocation8]  }
 0x11c   :  { %v689_v12 = vadd.f32 %v688_v5, %v687_v62  ;;  %v811_v13 = vadd.f32 %v810_v6, %v764_v63  ;;  %v693_v14 = vadd.f32 %v692_v7, %v1248_v15  ;;  %v765_v16 = vmul.f32 %v1252_v20, %v1252_v20  ;;  %s995_s21 = sshll.u32 %s1160_s2, 4  ;;  %s996_s21 = int_to_ptr.vmem [resolvable:$true] %s995_s21 }
 0x11d   :  { %v800_v17 = vrot.slane %v799_v8, 2  ;;  %v701_v18 = vadd.f32 %v700_v9, %v699_v3  ;;  %v804_v19 = vrot.slane %v763_v10, 4  ;;  %v705_v21 = vadd.f32 %v704_v11, %v1252_v20  ;;  %s1123_s22 = scalar_lea.vmem %s996_s21, 512  ;;  %p1128_p11 = scmp.lt.s32.totalorder %s996_s21, %s996_s21 }
 0x11e   :  { %v1326_v22 = vsel %vm870_vm1, %v673_v57, %v785_v60  ;;  %v812_v23 = vrot.slane %v811_v13, 2  ;;  %v694_v24 = vrot.slane %v693_v14, 2  ;;  %v816_v25 = vrot.slane %v765_v16, 4  ;;  %p1124_p10 = scmp.ne.s32.totalorder %s996_s21, %s1123_s22  ;;  %p1129_p12 = scmp.lt.s32.totalorder %s1123_s22, %s1123_s22 }
 0x11f   :  { %v690_v26 = vrot.slane %v689_v12, 1  ;;  %v801_v27 = vadd.f32 %v800_v17, %v799_v8  ;;  %v805_v28 = vadd.f32 %v804_v19, %v763_v10  ;;  %v706_v30 = vrot.slane %v705_v21, 2 }
 0x120   :  { %v702_v31 = vrot.slane %v701_v18, 1  ;;  %v813_v15 = vadd.f32 %v812_v23, %v811_v13  ;;  %v695_v32 = vadd.f32 %v694_v24, %v693_v14  ;;  %v817_v33 = vadd.f32 %v816_v25, %v765_v16  ;;  %p1130_p13 = por %p1129_p12, %p1128_p11 }
 0x121   :  { %v1329_v36 = vsel %vm870_vm1, %v685_v61, %v797_v1  ;;  %v802_v37 = vrot.slane %v801_v27, 1  ;;  %v806_v38 = vrot.slane %v805_v28, 2  ;;  %v707_v20 = vadd.f32 %v706_v30, %v705_v21 }
 0x122   :  { %v814_v39 = vrot.slane %v813_v15, 1  ;;  %v696_v41 = vrot.slane %v695_v32, 1  ;;  %v818_v42 = vrot.slane %v817_v33, 2  ;;  %v710_v43 = vrot.slane %v1255_v29, 4  ;;  %p1131_p0 = pnand %p1130_p13, %p1124_p10 }
 0x123   :  { %v803_v44 = vadd.f32 %v802_v37, %v801_v27  ;;  %v807_v45 = vadd.f32 %v806_v38, %v805_v28  ;;  %v708_v46 = vrot.slane %v707_v20, 1  ;;  %v766_v49 = vmul.f32 %v1255_v29, %v1255_v29 }
 0x124   :  { %v691_v50 = vadd.f32 %v690_v26, %v689_v12  ;;  %v703_v52 = vadd.f32 %v702_v31, %v701_v18  ;;  %v819_v53 = vadd.f32 %v818_v42, %v817_v33  ;;  %v711_v56 = vadd.f32 %v710_v43, %v1255_v29 }
 0x125   :  { %v815_v57 = vadd.f32 %v814_v39, %v813_v15  ;;  %v697_v51 = vadd.f32 %v696_v41, %v695_v32  ;;  %v808_v58 = vrot.slane %v807_v45, 1  ;;  %v822_v60 = vrot.slane %v766_v49, 4 }
 0x126   :  { %v1336_v61 = vsel %vm870_vm1, %v691_v50, %v803_v44  ;;  %v820_v62 = vrot.slane %v819_v53, 1  ;;  %v712_v63 = vrot.slane %v711_v56, 2  ;;  %v722_v1 = vrot.slane %v1258_v34, 4 }
 0x127   :  { %v709_v2 = vadd.f32 %v708_v46, %v707_v20  ;;  %v823_v3 = vadd.f32 %v822_v60, %v766_v49  ;;  %v768_v5 = vmul.f32 %v1258_v34, %v1258_v34  ;;  %v716_v6 = vrot.slane %v1260_v35, 4 }
 0x128   :  { %v809_v7 = vadd.f32 %v808_v58, %v807_v45  ;;  %v713_v29 = vadd.f32 %v712_v63, %v711_v56  ;;  %v723_v8 = vadd.f32 %v722_v1, %v1258_v34  ;;  %v767_v9 = vmul.f32 %v1260_v35, %v1260_v35 }
 0x129   :  { %v1346_v10 = vsel %vm870_vm1, %v703_v52, %v815_v57  ;;  %v824_v11 = vrot.slane %v823_v3, 2  ;;  %v834_v12 = vrot.slane %v768_v5, 4  ;;  %v717_v13 = vadd.f32 %v716_v6, %v1260_v35 }
 0x12a   :  { %v821_v14 = vadd.f32 %v820_v62, %v819_v53  ;;  %v714_v16 = vrot.slane %v713_v29, 1  ;;  %v724_v17 = vrot.slane %v723_v8, 2  ;;  %v828_v18 = vrot.slane %v767_v9, 4 }
 0x12b   :  { %v825_v19 = vadd.f32 %v824_v11, %v823_v3  ;;  %v835_v21 = vadd.f32 %v834_v12, %v768_v5  ;;  %v718_v23 = vrot.slane %v717_v13, 2  ;;  %v728_v24 = vrot.slane %v1264_v40, 4 }
 0x12c   :  { %v1351_v34 = vsel %vm870_vm1, %v697_v51, %v809_v7  ;;  %v725_v25 = vadd.f32 %v724_v17, %v723_v8  ;;  %v829_v26 = vadd.f32 %v828_v18, %v767_v9  ;;  %v769_v27 = vmul.f32 %v1264_v40, %v1264_v40 }
 0x12d   :  { %v826_v28 = vrot.slane %v825_v19, 1  ;;  %v836_v30 = vrot.slane %v835_v21, 2  ;;  %v719_v35 = vadd.f32 %v718_v23, %v717_v13  ;;  %v729_v31 = vadd.f32 %v728_v24, %v1264_v40 }
 0x12e   :  { %v726_v15 = vrot.slane %v725_v25, 1  ;;  %v830_v32 = vrot.slane %v829_v26, 2  ;;  %v840_v33 = vrot.slane %v769_v27, 4  ;;  %v734_v37 = vrot.slane %v1267_v47, 4 }
 0x12f   :  { %v1358_v38 = vsel %vm870_vm1, %v709_v2, %v821_v14  ;;  %v715_v20 = vadd.f32 %v714_v16, %v713_v29  ;;  %v837_v39 = vadd.f32 %v836_v30, %v835_v21  ;;  %v730_v41 = vrot.slane %v729_v31, 2 }
 0x130   :  { %v827_v42 = vadd.f32 %v826_v28, %v825_v19  ;;  %v831_v43 = vadd.f32 %v830_v32, %v829_v26  ;;  %v841_v44 = vadd.f32 %v840_v33, %v769_v27  ;;  %v735_v45 = vadd.f32 %v734_v37, %v1267_v47 }
 0x131   :  { %v727_v46 = vadd.f32 %v726_v15, %v725_v25  ;;  %v838_v49 = vrot.slane %v837_v39, 1  ;;  %v720_v50 = vrot.slane %v719_v35, 1  ;;  %v731_v40 = vadd.f32 %v730_v41, %v729_v31 }
 0x132   :  { %v832_v52 = vrot.slane %v831_v43, 1  ;;  %v842_v53 = vrot.slane %v841_v44, 2  ;;  %v736_v56 = vrot.slane %v735_v45, 2  ;;  %v770_v57 = vmul.f32 %v1267_v47, %v1267_v47 }
 0x133   :  { %v839_v51 = vadd.f32 %v838_v49, %v837_v39  ;;  %v732_v58 = vrot.slane %v731_v40, 1  ;;  %v746_v60 = vrot.slane %v1276_v54, 4  ;;  %v772_v62 = vmul.f32 %v1276_v54, %v1276_v54 }
 0x134   :  { %v833_v63 = vadd.f32 %v832_v52, %v831_v43  ;;  %v843_v1 = vadd.f32 %v842_v53, %v841_v44  ;;  %v737_v2 = vadd.f32 %v736_v56, %v735_v45  ;;  %v846_v3 = vrot.slane %v770_v57, 4 }
 0x135   :  { %v1367_v5 = vsel %vm870_vm1, %v715_v20, %v827_v42  ;;  %v721_v6 = vadd.f32 %v720_v50, %v719_v35  ;;  %v747_v7 = vadd.f32 %v746_v60, %v1276_v54  ;;  %v858_v29 = vrot.slane %v772_v62, 4 }
 0x136   :  { %v1371_v47 = vsel %vm870_vm1, %v727_v46, %v839_v51  ;;  %v733_v8 = vadd.f32 %v732_v58, %v731_v40  ;;  %v844_v9 = vrot.slane %v843_v1, 1  ;;  %v847_v11 = vadd.f32 %v846_v3, %v770_v57 }
 0x137   :  { %v748_v12 = vrot.slane %v747_v7, 2  ;;  %v859_v13 = vadd.f32 %v858_v29, %v772_v62  ;;  %v740_v14 = vrot.slane %v1278_v55, 4  ;;  %v771_v16 = vmul.f32 %v1278_v55, %v1278_v55 }
 0x138   :  { %v880_v17 = vsel %vm870_vm1, %v721_v6, %v833_v63  ;;  %v738_v18 = vrot.slane %v737_v2, 1  ;;  %v848_v19 = vrot.slane %v847_v11, 2  ;;  %v752_v54 = vrot.slane %v1287_v59, 4 }
 0x139   :  { %v749_v21 = vadd.f32 %v748_v12, %v747_v7  ;;  %v860_v23 = vrot.slane %v859_v13, 2  ;;  %v741_v24 = vadd.f32 %v740_v14, %v1278_v55  ;;  %v852_v25 = vrot.slane %v771_v16, 4 }
 0x13a   :  { %v845_v26 = vadd.f32 %v844_v9, %v843_v1  ;;  %v849_v27 = vadd.f32 %v848_v19, %v847_v11  ;;  %v753_v28 = vadd.f32 %v752_v54, %v1287_v59  ;;  %v773_v30 = vmul.f32 %v1287_v59, %v1287_v59 }
 0x13b   :  { %v750_v35 = vrot.slane %v749_v21, 1  ;;  %v861_v31 = vadd.f32 %v860_v23, %v859_v13  ;;  %v742_v15 = vrot.slane %v741_v24, 2  ;;  %v853_v32 = vadd.f32 %v852_v25, %v771_v16 }
 0x13c   :  { %v850_v33 = vrot.slane %v849_v27, 1  ;;  %v754_v37 = vrot.slane %v753_v28, 2  ;;  %v864_v20 = vrot.slane %v773_v30, 4  ;;  %v903_v39 = vcombine.low %v1294_v0, %v1326_v22 }
 0x13d   :  { %v739_v41 = vadd.f32 %v738_v18, %v737_v2  ;;  %v862_v55 = vrot.slane %v861_v31, 1  ;;  %v743_v42 = vadd.f32 %v742_v15, %v741_v24  ;;  %v854_v43 = vrot.slane %v853_v32, 2 }
 0x13e   :  { %v851_v44 = vadd.f32 %v850_v33, %v849_v27  ;;  %v755_v45 = vadd.f32 %v754_v37, %v753_v28  ;;  %v865_v46 = vadd.f32 %v864_v20, %v773_v30  ;;  %v904_v59 = vcombine.low %v1315_v4, %v1329_v36 }
 0x13f   :  { %v882_v49 = vsel %vm870_vm1, %v733_v8, %v845_v26  ;;  %v744_v50 = vrot.slane %v743_v42, 1  ;;  %v855_v40 = vadd.f32 %v854_v43, %v853_v32  ;;  %v911_v52 = vrot.slane %v903_v39, %v1272_v48 }
 0x140   :  { %v751_v53 = vadd.f32 %v750_v35, %v749_v21  ;;  %v863_v56 = vadd.f32 %v862_v55, %v861_v31  ;;  %v866_v57 = vrot.slane %v865_v46, 2  ;;  %v918_v0 = vrot.slane %v904_v59, %v1272_v48 }
 0x141   :  { %v856_v22 = vrot.slane %v855_v40, 1  ;;  %v883_v51 = vsel %vm870_vm1, %v739_v41, %v851_v44  ;;  %v756_v58 = vrot.slane %v755_v45, 1  ;;  %v920_v60 = vcombine.low %v1336_v61, %v1351_v34 }
 0x142   :  { %v745_v62 = vadd.f32 %v744_v50, %v743_v42  ;;  %v867_v4 = vadd.f32 %v866_v57, %v865_v46  ;;  %v919_v36 = vcombine.low %v911_v52, %v918_v0  ;;  %v921_v63 = vcombine.low %v1346_v10, %v1358_v38 }
 0x143   :  { %v857_v1 = vadd.f32 %v856_v22, %v855_v40  ;;  %v928_v2 = vrot.slane %v920_v60, %v1272_v48  ;;  %v937_v3 = vcombine.low %v1367_v5, %v880_v17  ;;  %v938_v6 = vcombine.low %v1371_v47, %v882_v49 }
 0x144   :  { %v868_v7 = vrot.slane %v867_v4, 1  ;;  %v935_v29 = vrot.slane %v921_v63, %v1272_v48  ;;  %975 = vst [vmem:[#allocation8] sm:$0xff] %v919_v36  ;;  %v885_v61 = vsel %vm870_vm1, %v751_v53, %v863_v56  ;;  %v757_v38 = vadd.f32 %v756_v58, %v755_v45 }
 0x145   :  { %v884_v8 = vsel %vm870_vm1, %v745_v62, %v857_v1  ;;  %v945_v34 = vrot.slane %v937_v3, %v1272_v48  ;;  %v952_v9 = vrot.slane %v938_v6, %v1272_v48 }
 0x146   :  { %v954_v10 = vcombine.low %v883_v51, %v884_v8  ;;  %v869_v11 = vadd.f32 %v868_v7, %v867_v4  ;;  %v936_v12 = vcombine.low %v928_v2, %v935_v29 }
 0x147   :  { %v953_v13 = vcombine.low %v945_v34, %v952_v9 }
 0x148   :  { %v886_v5 = vsel %vm870_vm1, %v757_v38, %v869_v11  ;;  %976 = vst [vmem:[#allocation8 + $0x8] sm:$0xff] %v936_v12  ;;  %v962_v14 = vrot.slane %v954_v10, %v1272_v48 }
 0x149   :  { %v955_v47 = vcombine.low %v885_v61, %v886_v5  ;;  %977 = vst [vmem:[#allocation8 + $0x10] sm:$0xff] %v953_v13 }
 0x14b   :  { %v969_v16 = vrot.slane %v955_v47, %v1272_v48 }
 0x14d   :  { %v970_v17 = vcombine.low %v962_v14, %v969_v16 }
 0x14f   :  { %978 = vst [vmem:[#allocation8 + $0x18] sm:$0xff] %v970_v17 }
 0x150   :  { %1134 = shalt.err (!%p1131_p0)
}
 0x151   :  { %s1135_s25 = scalar_lea.hbm %s1420_s3, 512 }
 0x152   :  { %p1136_p1 = scmp.ne.s32.totalorder %s1420_s3, %s1135_s25  ;;  %p1139_p2 = scmp.lt.u32.totalorder %s1135_s25, %s1420_s3 }
 0x154   :  { %p1141_p3 = pnand %p1139_p2, %p1136_p1 }
 0x156   :  { %1144 = shalt.err (!%p1141_p3)
}
 0x157   :  { %998 = dma.vmem_to_hbm [thread:$0]  %s996_s21, 512, %s1420_s3, [#allocation9]  }
 0x158   :  { %1149 = dma.done.wait [#allocation4], 2048  }
 0x159   :  { %1150 = vsyncadd [#allocation4], 4294965248 }
 0x15a   :  { %1151 = dma.done.wait [#allocation9], 512  }
 0x15b   :  { %1152 = vsyncadd [#allocation9], 4294966784 }
 0x15c   :  { %1005 = vsyncpa [#allocation3], 1 }
 0x15d   :  { %1006 = vsyncpa [#allocation6], 1 }
 0x15e   :  { %1007 = vsyncpa [#allocation4], 1 }
 0x15f   :  { %1008 = vsyncpa [#allocation9], 1 }

</bundles_post_ra>
